<compile_context>
chip_gen: v7x
topology: tpu7x:2x2x1
jax: 0.10.0
libtpu: 0.0.40
codegen_flags: <defaults>
</compile_context>

<pallas_src>
import functools

import jax
import jax.numpy as jnp
import numpy as np
from jax.experimental import pallas as pl
from jax.experimental.pallas import tpu as pltpu


def _round_up(x, m):
    return (x + m - 1) // m * m


def _pad2(a, rows, cols):
    return jnp.pad(a, ((0, rows - a.shape[0]), (0, cols - a.shape[1])))


# ----------------------------------------------------------------------------
# Pallas kernel: D-tiled MXU contraction with f32 accumulator, epilogue =
#   y  = relu(acc[:, :cp_y] + bias_y [+ residual])   -> y_ref (bf16 or f32)
#   ds =       acc[:, cp_y:] + bias_ds               -> ds_ref (f32, optional)
# (BN scales are pre-folded into the weight columns.)
# ----------------------------------------------------------------------------
def _conv_bn_kernel(has_ds, has_residual, *refs):
    idx = 0
    x_ref = refs[idx]; idx += 1
    w_ref = refs[idx]; idx += 1
    by_ref = refs[idx]; idx += 1
    bd_ref = None
    if has_ds:
        bd_ref = refs[idx]; idx += 1
    res_ref = None
    if has_residual:
        res_ref = refs[idx]; idx += 1
    y_ref = refs[idx]; idx += 1
    ds_ref = None
    if has_ds:
        ds_ref = refs[idx]; idx += 1
    acc_ref = refs[idx]

    d_step = pl.program_id(1)

    @pl.when(d_step == 0)
    def _():
        acc_ref[...] = jnp.zeros_like(acc_ref)

    acc_ref[...] += jnp.dot(x_ref[...], w_ref[...],
                            preferred_element_type=jnp.float32)

    @pl.when(d_step == pl.num_programs(1) - 1)
    def _():
        acc = acc_ref[...]
        cy = y_ref.shape[-1]                       # static, lane-aligned split
        y = acc[:, :cy] + by_ref[...]
        if res_ref is not None:
            y = y + res_ref[...]
        y_ref[...] = jnp.maximum(y, 0.0).astype(y_ref.dtype)
        if ds_ref is not None:
            ds_ref[...] = acc[:, cy:] + bd_ref[...]


def fused_conv_bn(x, w, bias_y, bias_ds=None, residual=None, *,
                  row_tile, d_tile, y_dtype=jnp.float32):
    """x: [n_pad, d_pad] (bf16), w: [d_pad, c_total] (bf16, scale-folded),
    bias_y: [1, cp_y] f32, bias_ds: [1, cp_ds] f32 or None,
    residual: [n_pad, cp_y] f32 or None.
    n_pad % row_tile == 0, d_pad % d_tile == 0, cp_* multiples of 128."""
    n, d = x.shape
    c_total = w.shape[1]
    cp_y = bias_y.shape[1]
    has_ds = bias_ds is not None
    has_residual = residual is not None
    cp_ds = c_total - cp_y
    assert n % row_tile == 0 and d % d_tile == 0
    assert cp_y % 128 == 0 and c_total % 128 == 0

    grid = (n // row_tile, d // d_tile)

    in_specs = [
        pl.BlockSpec((row_tile, d_tile), lambda i, j: (i, j)),
        pl.BlockSpec((d_tile, c_total), lambda i, j: (j, 0)),
        pl.BlockSpec((1, cp_y), lambda i, j: (0, 0)),
    ]
    args = [x, w, bias_y]
    if has_ds:
        in_specs.append(pl.BlockSpec((1, cp_ds), lambda i, j: (0, 0)))
        args.append(bias_ds)
    if has_residual:
        in_specs.append(pl.BlockSpec((row_tile, cp_y), lambda i, j: (i, 0)))
        args.append(residual)

    out_shapes = [jax.ShapeDtypeStruct((n, cp_y), y_dtype)]
    out_specs = [pl.BlockSpec((row_tile, cp_y), lambda i, j: (i, 0))]
    if has_ds:
        out_shapes.append(jax.ShapeDtypeStruct((n, cp_ds), jnp.float32))
        out_specs.append(pl.BlockSpec((row_tile, cp_ds), lambda i, j: (i, 0)))

    # VMEM budget: 2x (double buffered) streamed blocks + accumulator + slack.
    itemsize_y = jnp.dtype(y_dtype).itemsize
    streamed = (row_tile * d_tile * x.dtype.itemsize
                + d_tile * c_total * w.dtype.itemsize
                + (cp_y + cp_ds) * 4
                + (row_tile * cp_y * 4 if has_residual else 0)
                + row_tile * cp_y * itemsize_y
                + (row_tile * cp_ds * 4 if has_ds else 0))
    vmem_limit = int(min(max(2 * streamed + row_tile * c_total * 4 + (4 << 20),
                             32 << 20), 64 << 20))

    kernel = functools.partial(_conv_bn_kernel, has_ds, has_residual)
    return pl.pallas_call(
        kernel,
        out_shape=tuple(out_shapes) if has_ds else out_shapes[0],
        grid_spec=pltpu.PrefetchScalarGridSpec(
            num_scalar_prefetch=0,
            grid=grid,
            in_specs=in_specs,
            out_specs=tuple(out_specs) if has_ds else out_specs[0],
            scratch_shapes=[pltpu.VMEM((row_tile, c_total), jnp.float32)],
        ),
        compiler_params=pltpu.CompilerParams(
            dimension_semantics=("parallel", "arbitrary"),
            vmem_limit_bytes=vmem_limit,
        ),
    )(*args)


# ----------------------------------------------------------------------------
# Tile pickers
# ----------------------------------------------------------------------------
def pick_row_tile(n, target=512, min_steps=4, align=16):
    """>= min_steps grid rows (v7x: both TCs busy, >=2 pipelined steps each);
    multiple of 16 (bf16 sublane tile).  On v6e, raise `target` to 1024-2048."""
    rt = _round_up(max(-(-n // min_steps), align), align)
    return int(min(target, rt))


def pick_d_tile(d_pad, max_d_tile=1024):
    """Bound the resident weight block for v7x's 64 MiB VMEM."""
    return d_pad if d_pad <= max_d_tile else max_d_tile


# ----------------------------------------------------------------------------
# Glue: kernel offsets, neighbor map, flattened gather (addressing in JAX)
# ----------------------------------------------------------------------------
def build_kernel_offsets(ks, dilation):
    r = jnp.arange(ks, dtype=jnp.int32) - (ks // 2)
    offs = jnp.stack(jnp.meshgrid(r, r, r, indexing="ij"), -1).reshape(-1, 3)
    return offs * dilation  # [K, 3]


def build_neighbor_map(coords, offsets):
    # coords: [N, 4] = (batch, x, y, z).  Dense O(K*N^2) compare (demo scale).
    q = coords[None, :, 1:] + offsets[:, None, :]                 # [K, N, 3]
    same_xyz = (coords[None, None, :, 1:] == q[:, :, None, :]).all(-1)
    same_b = coords[None, None, :, 0] == coords[None, :, None, 0]
    eq = same_xyz & same_b                                        # [K, N, M]
    valid = eq.any(-1)
    nbr = jnp.argmax(eq, axis=-1).astype(jnp.int32)
    return nbr, valid


def gather_flat(x, nbr, valid, d_pad, n_pad):
    """Gather K neighbors per row, flatten to [n_pad, d_pad] (layout k-major)."""
    K, N = nbr.shape
    C = x.shape[1]
    g = jnp.where(valid[..., None], x[nbr], jnp.zeros((), x.dtype))
    g = jnp.transpose(g, (1, 0, 2)).reshape(N, K * C)
    return _pad2(g, n_pad, d_pad)


def fold_bn(gamma, beta, mean, var, eps=1e-5):
    scale = gamma / jnp.sqrt(var + eps)
    bias = beta - mean * scale
    return scale[None, :], bias[None, :]


# ----------------------------------------------------------------------------
# ResidualBlock forward (stride == 1; inc != outc -> fused 1x1 conv + BN branch)
# ----------------------------------------------------------------------------
def residual_block_forward(coords, feats, params, ks=3, dilation=1,
                           compute_dtype=jnp.bfloat16, row_tile=None,
                           nbr=None, valid=None):
    if nbr is None or valid is None:
        offs = build_kernel_offsets(ks, dilation)
        nbr, valid = build_neighbor_map(coords, offs)

    N, Cin = feats.shape
    K = ks ** 3
    k_center = (K - 1) // 2                  # offset (0,0,0) for odd ks
    Cout = params["w1"].shape[-1]
    has_ds = "wd" in params

    if row_tile is None:
        row_tile = pick_row_tile(N)
    assert row_tile % 16 == 0
    n_pad = _round_up(N, row_tile)
    cp = _round_up(Cout, 128)

    # ---- Pass 1: conv1+BN1+ReLU, fused with 1x1 downsample conv + BNd -------
    d1 = _round_up(K * Cin, 128)
    d1_tile = pick_d_tile(d1)
    d1 = _round_up(d1, d1_tile)

    xg1 = gather_flat(feats.astype(compute_dtype), nbr, valid, d1, n_pad)

    w1s = params["w1"].reshape(K * Cin, Cout) * params["s1"]      # fold BN1
    b1 = _pad2(params["b1"], 1, cp)

    if has_ds:
        wds = params["wd"][0] * params["sd"]                      # fold BNd
        w_packed = jnp.zeros((d1, 2 * cp), jnp.float32)
        w_packed = w_packed.at[:K * Cin, :Cout].set(w1s)
        w_packed = w_packed.at[k_center * Cin:(k_center + 1) * Cin,
                               cp:cp + Cout].set(wds)
        bd = _pad2(params["bd"], 1, cp)
        y1p, ds = fused_conv_bn(xg1, w_packed.astype(compute_dtype), b1, bd,
                                row_tile=row_tile, d_tile=d1_tile,
                                y_dtype=compute_dtype)
    else:
        w_packed = _pad2(w1s, d1, cp)
        y1p = fused_conv_bn(xg1, w_packed.astype(compute_dtype), b1,
                            row_tile=row_tile, d_tile=d1_tile,
                            y_dtype=compute_dtype)
        ds = _pad2(feats, n_pad, cp)                              # identity

    # ---- Pass 2: conv2 + BN2 + residual add + final ReLU --------------------
    d2 = _round_up(K * Cout, 128)
    d2_tile = pick_d_tile(d2)
    d2 = _round_up(d2, d2_tile)

    y1 = y1p[:N, :Cout]                                           # bf16
    xg2 = gather_flat(y1, nbr, valid, d2, n_pad)

    w2s = _pad2(params["w2"].reshape(K * Cout, Cout) * params["s2"], d2, cp)
    b2 = _pad2(params["b2"], 1, cp)
    out = fused_conv_bn(xg2, w2s.astype(compute_dtype), b2, residual=ds,
                        row_tile=row_tile, d_tile=d2_tile,
                        y_dtype=jnp.float32)
    return out[:N, :Cout]


# ----------------------------------------------------------------------------
# Pure-JAX reference (compute_dtype controls matmul operand precision; scale
# is folded into the weights before the cast, exactly like the kernel path).
# ----------------------------------------------------------------------------
def ref_forward(coords, feats, params, ks=3, dilation=1,
                compute_dtype=jnp.float32):
    offs = build_kernel_offsets(ks, dilation)
    nbr, valid = build_neighbor_map(coords, offs)
    cd = compute_dtype

    def conv(x, w, s):
        ws = (w * s[None]).astype(cd)
        g = jnp.where(valid[..., None], x[nbr], 0.0).astype(cd)
        return jnp.einsum("knc,kcd->nd", g, ws,
                          preferred_element_type=jnp.float32)

    y1 = jax.nn.relu(conv(feats, params["w1"], params["s1"]) + params["b1"])
    y2 = conv(y1, params["w2"], params["s2"]) + params["b2"]
    if "wd" in params:
        wds = (params["wd"][0] * params["sd"]).astype(cd)
        d = jnp.dot(feats.astype(cd), wds,
                    preferred_element_type=jnp.float32) + params["bd"]
    else:
        d = feats
    return jax.nn.relu(y2 + d)


# ----------------------------------------------------------------------------
def make_params(key, inc, outc, K, with_downsample):
    ks_ = jax.random.split(key, 6)

    def bn_params(k, c):
        k1, k2, k3, k4 = jax.random.split(k, 4)
        gamma = 1.0 + 0.1 * jax.random.normal(k1, (c,), jnp.float32)
        beta = 0.1 * jax.random.normal(k2, (c,), jnp.float32)
        mean = 0.05 * jax.random.normal(k3, (c,), jnp.float32)
        var = 0.5 + 0.5 * jnp.abs(jax.random.normal(k4, (c,), jnp.float32))
        return fold_bn(gamma, beta, mean, var)

    params = {}
    params["w1"] = 0.1 * jax.random.normal(ks_[0], (K, inc, outc), jnp.float32)
    params["w2"] = 0.1 * jax.random.normal(ks_[1], (K, outc, outc), jnp.float32)
    params["s1"], params["b1"] = bn_params(ks_[3], outc)
    params["s2"], params["b2"] = bn_params(ks_[4], outc)
    if with_downsample:
        params["wd"] = 0.1 * jax.random.normal(ks_[2], (1, inc, outc),
                                               jnp.float32)
        params["sd"], params["bd"] = bn_params(ks_[5], outc)
    return params


if __name__ == "__main__":
    key = jax.random.PRNGKey(0)
    k_f1, k_f2, k_p1, k_p2 = jax.random.split(key, 4)

    ks, dilation = 3, 1
    K = ks ** 3

    # 64 unique voxel coordinates (full 4x4x4 grid), single batch.
    xs = jnp.arange(4, dtype=jnp.int32)
    grid = jnp.stack(jnp.meshgrid(xs, xs, xs, indexing="ij"), -1).reshape(-1, 3)
    N = grid.shape[0]
    coords = jnp.concatenate([jnp.zeros((N, 1), jnp.int32), grid], axis=1)

    # Neighbor map built once per stage and reused by both blocks below.
    offs = build_kernel_offsets(ks, dilation)
    nbr, valid = build_neighbor_map(coords, offs)

    fwd = jax.jit(functools.partial(residual_block_forward,
                                    ks=ks, dilation=dilation))

    def check(out, feats, params):
        ref_bf16 = ref_forward(coords, feats, params, ks=ks, dilation=dilation,
                               compute_dtype=jnp.bfloat16)
        np.testing.assert_allclose(np.asarray(out), np.asarray(ref_bf16),
                                   rtol=2e-3, atol=2e-3)
        ref_f32 = ref_forward(coords, feats, params, ks=ks, dilation=dilation,
                              compute_dtype=jnp.float32)
        np.testing.assert_allclose(np.asarray(out), np.asarray(ref_f32),
                                   rtol=5e-2, atol=5e-2)

    # Case 1: inc != outc  -> fused 1x1 downsample conv + BN branch in pass 1.
    inc, outc = 4, 8
    feats1 = jax.random.normal(k_f1, (N, inc), jnp.float32)
    params1 = make_params(k_p1, inc, outc, K, with_downsample=True)
    out1 = jax.block_until_ready(fwd(coords, feats1, params1,
                                     nbr=nbr, valid=valid))
    check(out1, feats1, params1)

    # Case 2: inc == outc, stride == 1 -> identity residual path.
    inc2 = outc2 = 8
    feats2 = jax.random.normal(k_f2, (N, inc2), jnp.float32)
    params2 = make_params(k_p2, inc2, outc2, K, with_downsample=False)
    out2 = jax.block_until_ready(fwd(coords, feats2, params2,
                                     nbr=nbr, valid=valid))
    check(out2, feats2, params2)

    print("KERNEL_OK")
</pallas_src>

<mosaic_0001>
module attributes {stable_mosaic.version = 11 : i64} {
  func.func @_conv_bn_kernel(%arg0: i32, %arg1: i32, %arg2: memref<16x128xbf16, #tpu.memory_space<vmem>>, %arg3: memref<128x256xbf16, #tpu.memory_space<vmem>>, %arg4: memref<1x128xf32, #tpu.memory_space<vmem>>, %arg5: memref<1x128xf32, #tpu.memory_space<vmem>>, %arg6: memref<16x128xbf16, #tpu.memory_space<vmem>>, %arg7: memref<16x128xf32, #tpu.memory_space<vmem>>, %arg8: memref<16x256xf32, #tpu.memory_space<vmem>>) attributes {dimension_semantics = [#tpu.dimension_semantics<parallel>, #tpu.dimension_semantics<arbitrary>], iteration_bounds = array<i64: 4, 1>, scalar_prefetch = 0 : i64, scratch_operands = 1 : i64, tpu.core_type = #tpu.core_type<tc>, window_params = [{transform_indices = @transform_0, window_bounds = array<i64: 16, 128>}, {transform_indices = @transform_1, window_bounds = array<i64: 128, 256>}, {pipeline_mode = #tpu.pipeline_mode<synchronous>, transform_indices = @transform_2, window_bounds = array<i64: 1, 128>}, {pipeline_mode = #tpu.pipeline_mode<synchronous>, transform_indices = @transform_3, window_bounds = array<i64: 1, 128>}, {transform_indices = @transform_4, window_bounds = array<i64: 16, 128>}, {transform_indices = @transform_5, window_bounds = array<i64: 16, 128>}]} {
    %c0_i32 = arith.constant 0 : i32
    %0 = arith.cmpi eq, %arg1, %c0_i32 : i32
    %1 = arith.extui %0 : i1 to i32
    %c0_i32_0 = arith.constant 0 : i32
    %2 = arith.cmpi ne, %1, %c0_i32_0 : i32
    scf.if %2 {
      %cst_10 = arith.constant 0.000000e+00 : f32
      %12 = vector.broadcast %cst_10 : f32 to vector<16x256xf32>
      %c0_11 = arith.constant 0 : index
      %c0_12 = arith.constant 0 : index
      %13 = vector.load %arg8[%c0_11, %c0_12] : memref<16x256xf32, #tpu.memory_space<vmem>>, vector<16x256xf32>
      tpu.vector_store %arg8[%c0_11, %c0_12], %12 {strides = array<i32>} : memref<16x256xf32, #tpu.memory_space<vmem>>, vector<16x256xf32>,
    } else {
    }
    %c0 = arith.constant 0 : index
    %c0_1 = arith.constant 0 : index
    %3 = vector.load %arg8[%c0, %c0_1] : memref<16x256xf32, #tpu.memory_space<vmem>>, vector<16x256xf32>
    %c0_2 = arith.constant 0 : index
    %c0_3 = arith.constant 0 : index
    %4 = vector.load %arg2[%c0_2, %c0_3] : memref<16x128xbf16, #tpu.memory_space<vmem>>, vector<16x128xbf16>
    %c0_4 = arith.constant 0 : index
    %c0_5 = arith.constant 0 : index
    %5 = vector.load %arg3[%c0_4, %c0_5] : memref<128x256xbf16, #tpu.memory_space<vmem>>, vector<128x256xbf16>
    %cst = arith.constant dense<0.000000e+00> : vector<16x256xf32>
    %6 = tpu.matmul %4, %5, %cst {dimension_numbers = #tpu.dot_dimension_numbers<[1], [0], [0], [1], [0, 0, 1, 1], [], []>} : vector<16x128xbf16>, vector<128x256xbf16>, vector<16x256xf32> -> vector<16x256xf32>
    %7 = arith.addf %3, %6 : vector<16x256xf32>
    %c0_6 = arith.constant 0 : index
    %c0_7 = arith.constant 0 : index
    %8 = vector.load %arg8[%c0_6, %c0_7] : memref<16x256xf32, #tpu.memory_space<vmem>>, vector<16x256xf32>
    tpu.vector_store %arg8[%c0_6, %c0_7], %7 {strides = array<i32>} : memref<16x256xf32, #tpu.memory_space<vmem>>, vector<16x256xf32>,
    %c0_i32_8 = arith.constant 0 : i32
    %9 = arith.cmpi eq, %arg1, %c0_i32_8 : i32
    %10 = arith.extui %9 : i1 to i32
    %c0_i32_9 = arith.constant 0 : i32
    %11 = arith.cmpi ne, %10, %c0_i32_9 : i32
    scf.if %11 {
      %c0_10 = arith.constant 0 : index
      %c0_11 = arith.constant 0 : index
      %12 = vector.load %arg8[%c0_10, %c0_11] : memref<16x256xf32, #tpu.memory_space<vmem>>, vector<16x256xf32>
      %13 = vector.extract_strided_slice %12 {offsets = [0, 0], sizes = [16, 128], strides = [1, 1]} : vector<16x256xf32> to vector<16x128xf32>
      %c0_12 = arith.constant 0 : index
      %c0_13 = arith.constant 0 : index
      %14 = vector.load %arg4[%c0_12, %c0_13] : memref<1x128xf32, #tpu.memory_space<vmem>>, vector<1x128xf32>
      %15 = vector.broadcast %14 : vector<1x128xf32> to vector<16x128xf32>
      %16 = arith.addf %13, %15 : vector<16x128xf32>
      %cst_14 = arith.constant 0.000000e+00 : f32
      %17 = vector.broadcast %cst_14 : f32 to vector<16x128xf32>
      %18 = arith.maximumf %16, %17 : vector<16x128xf32>
      %19 = arith.truncf %18 : vector<16x128xf32> to vector<16x128xbf16>
      %c0_15 = arith.constant 0 : index
      %c0_16 = arith.constant 0 : index
      %20 = vector.load %arg6[%c0_15, %c0_16] : memref<16x128xbf16, #tpu.memory_space<vmem>>, vector<16x128xbf16>
      tpu.vector_store %arg6[%c0_15, %c0_16], %19 {strides = array<i32>} : memref<16x128xbf16, #tpu.memory_space<vmem>>, vector<16x128xbf16>,
      %21 = vector.extract_strided_slice %12 {offsets = [0, 128], sizes = [16, 128], strides = [1, 1]} : vector<16x256xf32> to vector<16x128xf32>
      %c0_17 = arith.constant 0 : index
      %c0_18 = arith.constant 0 : index
      %22 = vector.load %arg5[%c0_17, %c0_18] : memref<1x128xf32, #tpu.memory_space<vmem>>, vector<1x128xf32>
      %23 = vector.broadcast %22 : vector<1x128xf32> to vector<16x128xf32>
      %24 = arith.addf %21, %23 : vector<16x128xf32>
      %c0_19 = arith.constant 0 : index
      %c0_20 = arith.constant 0 : index
      %25 = vector.load %arg7[%c0_19, %c0_20] : memref<16x128xf32, #tpu.memory_space<vmem>>, vector<16x128xf32>
      tpu.vector_store %arg7[%c0_19, %c0_20], %24 {strides = array<i32>} : memref<16x128xf32, #tpu.memory_space<vmem>>, vector<16x128xf32>,
    } else {
    }
    return
  }
  func.func @transform_0(%arg0: i32, %arg1: i32) -> (i32, i32) {
    %c0_i32 = arith.constant 0 : i32
    return %arg0, %arg1 : i32, i32
  }
  func.func @transform_1(%arg0: i32, %arg1: i32) -> (i32, i32) {
    %c0_i32 = arith.constant 0 : i32
    %c0_i32_0 = arith.constant 0 : i32
    return %arg1, %c0_i32 : i32, i32
  }
  func.func @transform_2(%arg0: i32, %arg1: i32) -> (i32, i32) {
    %c0_i32 = arith.constant 0 : i32
    %c0_i32_0 = arith.constant 0 : i32
    %c0_i32_1 = arith.constant 0 : i32
    return %c0_i32, %c0_i32_0 : i32, i32
  }
  func.func @transform_3(%arg0: i32, %arg1: i32) -> (i32, i32) {
    %c0_i32 = arith.constant 0 : i32
    %c0_i32_0 = arith.constant 0 : i32
    %c0_i32_1 = arith.constant 0 : i32
    return %c0_i32, %c0_i32_0 : i32, i32
  }
  func.func @transform_4(%arg0: i32, %arg1: i32) -> (i32, i32) {
    %c0_i32 = arith.constant 0 : i32
    %c0_i32_0 = arith.constant 0 : i32
    return %arg0, %c0_i32 : i32, i32
  }
  func.func @transform_5(%arg0: i32, %arg1: i32) -> (i32, i32) {
    %c0_i32 = arith.constant 0 : i32
    %c0_i32_0 = arith.constant 0 : i32
    return %arg0, %c0_i32 : i32, i32
  }
}

module attributes {stable_mosaic.version = 11 : i64} {
  func.func @_conv_bn_kernel(%arg0: i32, %arg1: i32, %arg2: memref<16x256xbf16, #tpu.memory_space<vmem>>, %arg3: memref<256x128xbf16, #tpu.memory_space<vmem>>, %arg4: memref<1x128xf32, #tpu.memory_space<vmem>>, %arg5: memref<16x128xf32, #tpu.memory_space<vmem>>, %arg6: memref<16x128xf32, #tpu.memory_space<vmem>>, %arg7: memref<16x128xf32, #tpu.memory_space<vmem>>) attributes {dimension_semantics = [#tpu.dimension_semantics<parallel>, #tpu.dimension_semantics<arbitrary>], iteration_bounds = array<i64: 4, 1>, scalar_prefetch = 0 : i64, scratch_operands = 1 : i64, tpu.core_type = #tpu.core_type<tc>, window_params = [{transform_indices = @transform_0, window_bounds = array<i64: 16, 256>}, {transform_indices = @transform_1, window_bounds = array<i64: 256, 128>}, {pipeline_mode = #tpu.pipeline_mode<synchronous>, transform_indices = @transform_2, window_bounds = array<i64: 1, 128>}, {transform_indices = @transform_3, window_bounds = array<i64: 16, 128>}, {transform_indices = @transform_4, window_bounds = array<i64: 16, 128>}]} {
    %c0_i32 = arith.constant 0 : i32
    %0 = arith.cmpi eq, %arg1, %c0_i32 : i32
    %1 = arith.extui %0 : i1 to i32
    %c0_i32_0 = arith.constant 0 : i32
    %2 = arith.cmpi ne, %1, %c0_i32_0 : i32
    scf.if %2 {
      %cst_10 = arith.constant 0.000000e+00 : f32
      %12 = vector.broadcast %cst_10 : f32 to vector<16x128xf32>
      %c0_11 = arith.constant 0 : index
      %c0_12 = arith.constant 0 : index
      %13 = vector.load %arg7[%c0_11, %c0_12] : memref<16x128xf32, #tpu.memory_space<vmem>>, vector<16x128xf32>
      tpu.vector_store %arg7[%c0_11, %c0_12], %12 {strides = array<i32>} : memref<16x128xf32, #tpu.memory_space<vmem>>, vector<16x128xf32>,
    } else {
    }
    %c0 = arith.constant 0 : index
    %c0_1 = arith.constant 0 : index
    %3 = vector.load %arg7[%c0, %c0_1] : memref<16x128xf32, #tpu.memory_space<vmem>>, vector<16x128xf32>
    %c0_2 = arith.constant 0 : index
    %c0_3 = arith.constant 0 : index
    %4 = vector.load %arg2[%c0_2, %c0_3] : memref<16x256xbf16, #tpu.memory_space<vmem>>, vector<16x256xbf16>
    %c0_4 = arith.constant 0 : index
    %c0_5 = arith.constant 0 : index
    %5 = vector.load %arg3[%c0_4, %c0_5] : memref<256x128xbf16, #tpu.memory_space<vmem>>, vector<256x128xbf16>
    %cst = arith.constant dense<0.000000e+00> : vector<16x128xf32>
    %6 = tpu.matmul %4, %5, %cst {dimension_numbers = #tpu.dot_dimension_numbers<[1], [0], [0], [1], [0, 0, 1, 1], [], []>} : vector<16x256xbf16>, vector<256x128xbf16>, vector<16x128xf32> -> vector<16x128xf32>
    %7 = arith.addf %3, %6 : vector<16x128xf32>
    %c0_6 = arith.constant 0 : index
    %c0_7 = arith.constant 0 : index
    %8 = vector.load %arg7[%c0_6, %c0_7] : memref<16x128xf32, #tpu.memory_space<vmem>>, vector<16x128xf32>
    tpu.vector_store %arg7[%c0_6, %c0_7], %7 {strides = array<i32>} : memref<16x128xf32, #tpu.memory_space<vmem>>, vector<16x128xf32>,
    %c0_i32_8 = arith.constant 0 : i32
    %9 = arith.cmpi eq, %arg1, %c0_i32_8 : i32
    %10 = arith.extui %9 : i1 to i32
    %c0_i32_9 = arith.constant 0 : i32
    %11 = arith.cmpi ne, %10, %c0_i32_9 : i32
    scf.if %11 {
      %c0_10 = arith.constant 0 : index
      %c0_11 = arith.constant 0 : index
      %12 = vector.load %arg7[%c0_10, %c0_11] : memref<16x128xf32, #tpu.memory_space<vmem>>, vector<16x128xf32>
      %c0_12 = arith.constant 0 : index
      %c0_13 = arith.constant 0 : index
      %13 = vector.load %arg4[%c0_12, %c0_13] : memref<1x128xf32, #tpu.memory_space<vmem>>, vector<1x128xf32>
      %14 = vector.broadcast %13 : vector<1x128xf32> to vector<16x128xf32>
      %15 = arith.addf %12, %14 : vector<16x128xf32>
      %c0_14 = arith.constant 0 : index
      %c0_15 = arith.constant 0 : index
      %16 = vector.load %arg5[%c0_14, %c0_15] : memref<16x128xf32, #tpu.memory_space<vmem>>, vector<16x128xf32>
      %17 = arith.addf %15, %16 : vector<16x128xf32>
      %cst_16 = arith.constant 0.000000e+00 : f32
      %18 = vector.broadcast %cst_16 : f32 to vector<16x128xf32>
      %19 = arith.maximumf %17, %18 : vector<16x128xf32>
      %c0_17 = arith.constant 0 : index
      %c0_18 = arith.constant 0 : index
      %20 = vector.load %arg6[%c0_17, %c0_18] : memref<16x128xf32, #tpu.memory_space<vmem>>, vector<16x128xf32>
      tpu.vector_store %arg6[%c0_17, %c0_18], %19 {strides = array<i32>} : memref<16x128xf32, #tpu.memory_space<vmem>>, vector<16x128xf32>,
    } else {
    }
    return
  }
  func.func @transform_0(%arg0: i32, %arg1: i32) -> (i32, i32) {
    %c0_i32 = arith.constant 0 : i32
    return %arg0, %arg1 : i32, i32
  }
  func.func @transform_1(%arg0: i32, %arg1: i32) -> (i32, i32) {
    %c0_i32 = arith.constant 0 : i32
    %c0_i32_0 = arith.constant 0 : i32
    return %arg1, %c0_i32 : i32, i32
  }
  func.func @transform_2(%arg0: i32, %arg1: i32) -> (i32, i32) {
    %c0_i32 = arith.constant 0 : i32
    %c0_i32_0 = arith.constant 0 : i32
    %c0_i32_1 = arith.constant 0 : i32
    return %c0_i32, %c0_i32_0 : i32, i32
  }
  func.func @transform_3(%arg0: i32, %arg1: i32) -> (i32, i32) {
    %c0_i32 = arith.constant 0 : i32
    %c0_i32_0 = arith.constant 0 : i32
    return %arg0, %c0_i32 : i32, i32
  }
  func.func @transform_4(%arg0: i32, %arg1: i32) -> (i32, i32) {
    %c0_i32 = arith.constant 0 : i32
    %c0_i32_0 = arith.constant 0 : i32
    return %arg0, %c0_i32 : i32, i32
  }
}

</mosaic_0001>

<bundles_post_ra>
// kernel: residual_block_forward.2
= control target key start
LH: loop header
LB: loop body
LE: loop exit
PB: predicated region body
PF: predicated region fallthrough
CT: control target
= control target key end

     0   :  { %s761_s18 = smov 0   ;;  %s763_s19 = smov 0   ;;  %s859_s0 = inlined_call_operand.vmem [shape: bf16[64,128], index: 0, kind: input, shape index: {}]   ;;  %s860_s1 = inlined_call_operand.vmem [shape: bf16[128,256], index: 1, kind: input, shape index: {}]   ;;  %s861_s2 = inlined_call_operand.vmem [shape: f32[1,128], index: 2, kind: input, shape index: {}]   ;;  %s862_s3 = inlined_call_operand.vmem [shape: f32[1,128], index: 3, kind: input, shape index: {}]   ;;  %s863_s4 = inlined_call_operand.vmem [shape: bf16[64,128], index: 4, kind: output, shape index: {0}]   ;;  %s864_s5 = inlined_call_operand.vmem [shape: f32[64,128], index: 5, kind: output, shape index: {1}]  }
   0x1   :  { %s765_s20 = smov 0  }
   0x2 LB: > { %s28_s21 = sadd.s32 1, %s724_s19  ;;  %p619_p0 = scmp.ge.s32.totalorder %s728_s20, 1  ;;  %s728_s20 = sphi %s765_s20, %s16_s20   ;;  %s724_s19 = sphi %s763_s19, %s866_s19   ;;  %s720_s18 = sphi %s761_s18, %s865_s18  }
   0x3   : > { %p30_p1 = scmp.ge.s32.totalorder %s28_s21, 4  ;;  %p220_p2 = scmp.lt.s32.totalorder %s728_s20, 5 }
   0x5   : > { %s868_s21 = smov (%p30_p1, %s28_s21), 0  ;;  %p221_p3 = pnand %p619_p0, %p220_p2 }
   0x6   : > { %v681_v0 = vld [vmem:[%s860_s1 + $0x4] ss:$8 sps:$4 sm:$0xff] (!%p221_p3)   ;;  %s620_s24 = sshll.u32 (!%p221_p3), %s720_s18, 1  ;;  %v683_v1 = vld [vmem:[%s860_s1] ss:$8 sps:$4 sm:$0xff] (!%p221_p3)   ;;  %v730_v2 = vmov (!%p221_p3), 0  }
   0x7   : > { %224 = sbr.rel (%p221_p3) target bundleno = 260 (0x104), region = 36  ;;  %439 = vmatprep.mubr.bf16.mxu0 (!%p221_p3), %v730_v2  ;;  %p263_p4 = scmp.lt.s32.totalorder (!%p221_p3), %s620_s24, 7  ;;  %407 = vmatprep.subr.bf16.mxu0 (!%p221_p3), %v681_v0  ;;  %v684_v3 = vld [vmem:[%s860_s1 + $0x14] ss:$8 sps:$4 sm:$0xff] (!%p221_p3)   ;;  %v686_v4 = vld [vmem:[%s860_s1 + $0x10] ss:$8 sps:$4 sm:$0xff] (!%p221_p3)  }
   0x8   : > { %408 = vmatpush1.bf16.msra.mxu0 (!%p221_p3), %v683_v1  ;;  %v687_v5 = vld [vmem:[%s860_s1 + $0x24] ss:$8 sps:$4 sm:$0xff] (!%p221_p3)   ;;  %v689_v6 = vld [vmem:[%s860_s1 + $0x20] ss:$8 sps:$4 sm:$0xff] (!%p221_p3)   ;;  %v690_v7 = vld [vmem:[%s860_s1 + $0x34] ss:$8 sps:$4 sm:$0xff] (!%p221_p3)  }
   0x9   : > { %409 = vmatprep.subr.bf16.mxu0 (!%p221_p3), %v684_v3  ;;  %v692_v8 = vld [vmem:[%s860_s1 + $0x30] ss:$8 sps:$4 sm:$0xff] (!%p221_p3)   ;;  %v693_v9 = vld [vmem:[%s860_s1 + $0x44] ss:$8 sps:$4 sm:$0xff] (!%p221_p3)   ;;  %v695_v10 = vld [vmem:[%s860_s1 + $0x40] ss:$8 sps:$4 sm:$0xff] (!%p221_p3)  }
   0xa   : > { %v696_v11 = vld [vmem:[%s860_s1 + $0x54] ss:$8 sps:$4 sm:$0xff] (!%p221_p3)   ;;  %v698_v12 = vld [vmem:[%s860_s1 + $0x50] ss:$8 sps:$4 sm:$0xff] (!%p221_p3)   ;;  %v699_v13 = vld [vmem:[%s860_s1 + $0x64] ss:$8 sps:$4 sm:$0xff] (!%p221_p3)  }
   0xb   : > { %v701_v14 = vld [vmem:[%s860_s1 + $0x60] ss:$8 sps:$4 sm:$0xff] (!%p221_p3)   ;;  %v702_v15 = vld [vmem:[%s860_s1 + $0x74] ss:$8 sps:$4 sm:$0xff] (!%p221_p3)   ;;  %v704_v16 = vld [vmem:[%s860_s1 + $0x70] ss:$8 sps:$4 sm:$0xff] (!%p221_p3)  }
   0xc   : > { %410 = vmatpush1.bf16.msra.mxu0 (!%p221_p3), %v686_v4  ;;  %v643_v18 = vld [vmem:[%s861_s2] ss:$0 sm:$0xff] (!%p221_p3) }
   0xd   : > { %411 = vmatprep.subr.bf16.mxu0 (!%p221_p3), %v687_v5  ;;  %v646_v19 = vld [vmem:[%s862_s3] ss:$0 sm:$0xff] (!%p221_p3) }
   0xe   : > { %s870_s24 = smov (!%p263_p4, %s620_s24), 7 }
   0xf   : > { %s621_s8 = sshll.u32 %s870_s24, 2  ;;  %s625_s17 = sshll.u32 %s870_s24, 3 }
  0x10   : > { %s269_s15 = scalar_lea.vmem %s859_s0, %s621_s8  ;;  %412 = vmatpush1.bf16.msra.mxu0 %v689_v6  ;;  %s288_s26 = scalar_lea.vmem %s864_s5, %s625_s17 }
  0x11   : > { %413 = vmatprep.subr.bf16.mxu0 %v690_v7  ;;  %v705_v17 = vld [vmem:[%s269_s15] sm:$0xff]   ;;  %s282_s28 = scalar_lea.vmem %s863_s4, %s621_s8 }
  0x14   : > { %414 = vmatpush1.bf16.msra.mxu0 %v692_v8 }
  0x15   : > { %415 = vmatprep.subr.bf16.mxu0 %v693_v9 }
  0x18   : > { %416 = vmatpush1.bf16.msra.mxu0 %v695_v10 }
  0x19   : > { %417 = vmatprep.subr.bf16.mxu0 %v696_v11 }
  0x1c   : > { %418 = vmatpush1.bf16.msra.mxu0 %v698_v12 }
  0x1d   : > { %419 = vmatprep.subr.bf16.mxu0 %v699_v13 }
  0x20   : > { %420 = vmatpush1.bf16.msra.mxu0 %v701_v14 }
  0x21   : > { %421 = vmatprep.subr.bf16.mxu0 %v702_v15 }
  0x24   : > { %422 = vmatpush1.bf16.msra.mxu0 %v704_v16 }
  0x27   : > { %440 = vmatmul.mubr.bf16.vlgmr.msra.gmra.mrb[0].mxu0 %v705_v17 }
  0xfa   : > { %v441_v20 = vpop.f32.mrb[0].mxu0 }
  0xfb   : > { %v472_v21 = vadd.f32 %v643_v18, %v441_v20  ;;  %v443_v22 = vpop.f32.mrb[1].mxu0 }
  0xfc   : > { %v493_v23 = vadd.f32 %v646_v19, %v443_v22  ;;  %v445_v24 = vpop.f32.mrb[2].mxu0 }
  0xfd   : > { %v473_v25 = vadd.f32 %v643_v18, %v445_v24  ;;  %v447_v26 = vpop.f32.mrb[3].mxu0  ;;  %v474_v28 = vmax.f32 %v472_v21, 0.0 }
  0xfe   : > { %495 = vst [vmem:[%s288_s26] sm:$0xff] %v493_v23  ;;  %v494_v27 = vadd.f32 %v646_v19, %v447_v26 }
  0xff   : > { %v475_v29 = vmax.f32 %v473_v25, 0.0 }
 0x100   : > { %496 = vst [vmem:[%s288_s26 + $0x8] sm:$0xff] %v494_v27 }
 0x101   : > { %v654_v30 = vpack.c.bf16 %v475_v29, %v474_v28 }
 0x103   : > { %655 = vst [vmem:[%s282_s28] sm:$0xff] %v654_v30  }
 0x104 PF: > { %s16_s20 = sadd.s32 1, %s728_s20   ;;  %s865_s18 = smov %s724_s19 }
 0x105   : > { %p13_p5 = scmp.ge.s32.totalorder %s16_s20, 6   ;;  %s866_s19 = smov %s868_s21 }
 0x107   :  { %15 = sbr.rel (!%p13_p5) target bundleno = 2 (0x2), region = 89 }

// kernel: residual_block_forward.3
= control target key start
LH: loop header
LB: loop body
LE: loop exit
PB: predicated region body
PF: predicated region fallthrough
CT: control target
= control target key end

     0   :  { %s739_s15 = smov 0   ;;  %s741_s16 = smov 0   ;;  %s831_s0 = inlined_call_operand.vmem [shape: bf16[64,256], index: 0, kind: input, shape index: {}]   ;;  %s832_s1 = inlined_call_operand.vmem [shape: bf16[256,128], index: 1, kind: input, shape index: {}]   ;;  %s833_s2 = inlined_call_operand.vmem [shape: f32[1,128], index: 2, kind: input, shape index: {}]   ;;  %s834_s3 = inlined_call_operand.vmem [shape: f32[64,128], index: 3, kind: input, shape index: {}]   ;;  %s835_s4 = inlined_call_operand.vmem [shape: f32[64,128], index: 4, kind: output, shape index: {}]  }
   0x1   :  { %s743_s17 = smov 0  }
   0x2 LB: > { %s26_s18 = sadd.s32 1, %s708_s16  ;;  %p595_p0 = scmp.ge.s32.totalorder %s712_s17, 1  ;;  %s712_s17 = sphi %s743_s17, %s14_s17   ;;  %s708_s16 = sphi %s741_s16, %s837_s16   ;;  %s704_s15 = sphi %s739_s15, %s836_s15  }
   0x3   : > { %p28_p1 = scmp.ge.s32.totalorder %s26_s18, 4  ;;  %p205_p2 = scmp.lt.s32.totalorder %s712_s17, 5 }
   0x5   : > { %s839_s18 = smov (%p28_p1, %s26_s18), 0  ;;  %p206_p3 = pnand %p595_p0, %p205_p2 }
   0x6   : > { %v671_v0 = vld [vmem:[%s832_s1 + $0x40] sm:$0xff] (!%p206_p3)   ;;  %s596_s21 = sshll.u32 (!%p206_p3), %s704_s15, 1  ;;  %v673_v2 = vld [vmem:[%s832_s1 + $0x48] sm:$0xff] (!%p206_p3)   ;;  %v675_v4 = vld [vmem:[%s832_s1 + $0x50] sm:$0xff] (!%p206_p3)  }
   0x7   : > { %209 = sbr.rel (%p206_p3) target bundleno = 263 (0x107), region = 36  ;;  %v672_v1 = vld [vmem:[%s832_s1] sm:$0xff] (!%p206_p3)   ;;  %625 = vmatprep.subr.bf16.mxu0 (!%p206_p3), %v671_v0  ;;  %v674_v3 = vld [vmem:[%s832_s1 + $0x8] sm:$0xff] (!%p206_p3)   ;;  %p248_p4 = scmp.lt.s32.totalorder (!%p206_p3), %s596_s21, 7  ;;  %v676_v5 = vld [vmem:[%s832_s1 + $0x10] sm:$0xff] (!%p206_p3)  }
   0x8   : > { %626 = vmatpush3.bf16.msra.mxu0 (!%p206_p3), %v672_v1  ;;  %v677_v6 = vld [vmem:[%s832_s1 + $0x58] sm:$0xff] (!%p206_p3)   ;;  %v679_v8 = vld [vmem:[%s832_s1 + $0x60] sm:$0xff] (!%p206_p3)   ;;  %v681_v10 = vld [vmem:[%s832_s1 + $0x68] sm:$0xff] (!%p206_p3)  }
   0x9   : > { %627 = vmatprep.subr.bf16.mxu0 (!%p206_p3), %v673_v2  ;;  %v678_v7 = vld [vmem:[%s832_s1 + $0x18] sm:$0xff] (!%p206_p3)   ;;  %v680_v9 = vld [vmem:[%s832_s1 + $0x20] sm:$0xff] (!%p206_p3)   ;;  %v682_v12 = vld [vmem:[%s832_s1 + $0x28] sm:$0xff] (!%p206_p3)  }
   0xa   : > { %v683_v13 = vld [vmem:[%s832_s1 + $0x70] sm:$0xff] (!%p206_p3)   ;;  %v685_v15 = vld [vmem:[%s832_s1 + $0x78] sm:$0xff] (!%p206_p3)   ;;  %v621_v20 = vld [vmem:[%s833_s2] ss:$0 sm:$0xff] (!%p206_p3) }
   0xb   : > { %v684_v14 = vld [vmem:[%s832_s1 + $0x30] sm:$0xff] (!%p206_p3)   ;;  %v686_v16 = vld [vmem:[%s832_s1 + $0x38] sm:$0xff] (!%p206_p3)  }
   0xc   : > { %628 = vmatpush3.bf16.msra.mxu0 (!%p206_p3), %v674_v3 }
   0xd   : > { %629 = vmatprep.subr.bf16.mxu0 (!%p206_p3), %v675_v4 }
   0xe   : > { %s841_s21 = smov (!%p248_p4, %s596_s21), 7 }
   0xf   : > { %s781_s10 = sshll.u32 %s841_s21, 3 }
  0x10   : > { %630 = vmatpush3.bf16.msra.mxu0 %v676_v5  ;;  %s255_s15 = scalar_lea.vmem %s831_s0, %s781_s10  ;;  %s268_s9 = scalar_lea.vmem %s834_s3, %s781_s10 }
  0x11   : > { %631 = vmatprep.subr.bf16.mxu0 %v677_v6  ;;  %v689_v11 = vld [vmem:[%s255_s15 + $0x4] ss:$8 sps:$4 sm:$0xff]   ;;  %v687_v17 = vld [vmem:[%s255_s15] ss:$8 sps:$4 sm:$0xff]   ;;  %s274_s15 = scalar_lea.vmem %s835_s4, %s781_s10 }
  0x12   : > { %457 = vmatprep.mubr.bf16.mxu0 %v689_v11  ;;  %v484_v23 = vld [vmem:[%s268_s9] sm:$0xff]  ;;  %v485_v27 = vld [vmem:[%s268_s9 + $0x8] sm:$0xff] }
  0x14   : > { %632 = vmatpush3.bf16.msra.mxu0 %v678_v7 }
  0x15   : > { %633 = vmatprep.subr.bf16.mxu0 %v679_v8 }
  0x18   : > { %634 = vmatpush3.bf16.msra.mxu0 %v680_v9 }
  0x19   : > { %635 = vmatprep.subr.bf16.mxu0 %v681_v10 }
  0x1c   : > { %636 = vmatpush3.bf16.msra.mxu0 %v682_v12 }
  0x1d   : > { %637 = vmatprep.subr.bf16.mxu0 %v683_v13 }
  0x20   : > { %638 = vmatpush3.bf16.msra.mxu0 %v684_v14 }
  0x21   : > { %639 = vmatprep.subr.bf16.mxu0 %v685_v15 }
  0x24   : > { %640 = vmatpush3.bf16.msra.mxu0 %v686_v16 }
  0x27   : > { %458 = vmatmul.mubr.bf16.vlgmr.msra.gmra.mrb[0].mxu0 %v687_v17 }
  0xfa   : > { %v641_v18 = vpop.f32.mrb[0].mxu0 }
  0xfb   : > { %v642_v19 = vpop.f32.mrb[1].mxu0 }
  0xfc   : > { %v643_v21 = vadd.f32 %v642_v19, %v641_v18  ;;  %v644_v22 = vpop.f32.mrb[2].mxu0 }
  0xfd   : > { %v645_v24 = vpop.f32.mrb[3].mxu0 }
  0xfe   : > { %v482_v25 = vadd.f32 %v643_v21, %v621_v20  ;;  %v646_v26 = vadd.f32 %v645_v24, %v644_v22 }
 0x100   : > { %v486_v28 = vadd.f32 %v484_v23, %v482_v25  ;;  %v483_v29 = vadd.f32 %v646_v26, %v621_v20 }
 0x102   : > { %v488_v30 = vmax.f32 %v486_v28, 0.0  ;;  %v487_v31 = vadd.f32 %v485_v27, %v483_v29 }
 0x104   : > { %490 = vst [vmem:[%s274_s15] sm:$0xff] %v488_v30  ;;  %v489_v32 = vmax.f32 %v487_v31, 0.0 }
 0x106   : > { %491 = vst [vmem:[%s274_s15 + $0x8] sm:$0xff] %v489_v32 }
 0x107 PF: > { %s14_s17 = sadd.s32 1, %s712_s17   ;;  %s836_s15 = smov %s708_s16 }
 0x108   : > { %p11_p5 = scmp.ge.s32.totalorder %s14_s17, 6   ;;  %s837_s16 = smov %s839_s18 }
 0x10a   :  { %13 = sbr.rel (!%p11_p5) target bundleno = 2 (0x2), region = 80 }

</bundles_post_ra>
